<compile_context>
chip_gen: v5e
topology: v5e:2x2
jax: 0.10.0
libtpu: 0.0.40
codegen_flags: <defaults>
</compile_context>

<pallas_src>
import jax
import jax.numpy as jnp
from jax import lax
from jax.experimental import pallas as pl
from jax.experimental.pallas import tpu as pltpu

# ---- problem sizes (small, consistent with the module's forward) -----------
B = 2                       # batch
C_IN, H_IN, W_IN = 4, 8, 8  # NCHW input
D = C_IN * H_IN * W_IN      # 256  flattened input dim
HID = 128                   # hidden dim of synthetic net
C_OUT = 32                  # output dim C of y  (y.shape == (B, C_OUT))


# ---------------------------------------------------------------------------
# Single fused kernel:
#   forward:   h = x @ W1 ; a = tanh(h) ; y = a @ W2
#   jacobian:  Jv_{(b,ii),:} = (W2[:,ii]^T * (1 - a_b^2)) @ W1^T
#              R = 0.5/B * ||Jv||_F^2                    (num_proj = C)
# ---------------------------------------------------------------------------
def _fused_kernel(x_ref, w1_ref, w2_ref, y_ref, r_ref):
    x = x_ref[...]            # (B, D)       f32
    w1 = w1_ref[...]          # (D, HID)     f32
    w2 = w2_ref[...]          # (HID, C_OUT) f32

    # ---- forward pass -------------------------------------------------
    # h matmul stays f32: M=2 rows -> fixed MXU-drain latency, not throughput.
    h = jnp.dot(x, w1, preferred_element_type=jnp.float32)          # (B, HID)
    a = jnp.tanh(h)                                                  # f32 (EUP)
    # y matmul: bf16 MXU operands, f32 accumulation.
    y_ref[...] = jnp.dot(a.astype(jnp.bfloat16), w2.astype(jnp.bfloat16),
                         preferred_element_type=jnp.float32)         # (B, C_OUT)

    # ---- collapsed Jacobian-trace --------------------------------------
    t = 1.0 - a * a           # tanh' gate, f32 elementwise            (B, HID)
    w2t = w2.T                # (C_OUT, HID), single small in-kernel transpose

    # G[b*C_OUT + ii, :] = W2[:, ii]^T * (1 - a_b^2): one broadcast multiply
    # plus a layout-free (B, C_OUT, HID) -> (B*C_OUT, HID) merge (32 % 8 == 0).
    g = (t[:, None, :] * w2t[None, :, :]).reshape(B * C_OUT, HID)   # (64, 128)

    # Jv = G @ W1^T: contract the HID axis of both operands on the original W1
    # layout (no wrapper-side transpose).  bf16 operands, f32 accumulation.
    jv = lax.dot_general(
        g.astype(jnp.bfloat16), w1.astype(jnp.bfloat16),
        dimension_numbers=(((1,), (1,)), ((), ())),
        preferred_element_type=jnp.float32,
    )                                                                # (64, 256)

    # R = 0.5 * sum_ii C*||Jv_ii||^2 / (num_proj*B); num_proj = C collapses to
    # 0.5/B * ||Jv||_F^2.  Scalar goes straight to SMEM.
    r_ref[0, 0] = (0.5 / B) * jnp.sum(jv * jv)


def jacobian_reg_forward(x, w1, w2):
    """Returns (y, R) for y = tanh(x_flat @ W1) @ W2 and the Jacobian reg."""
    x_flat = x.reshape(x.shape[0], -1)            # NCHW -> (B, D), row-major

    flops = (2 * B * D * HID            # h = x @ W1
             + 2 * B * HID * C_OUT      # y = a @ W2
             + 2 * (B * C_OUT) * HID * D)  # Jv contraction
    bytes_accessed = 4 * (B * D + D * HID + HID * C_OUT + B * C_OUT + 1)

    y, r = pl.pallas_call(
        _fused_kernel,
        # Gridless: everything (~200 KiB) is VMEM-resident, full-array blocks.
        out_shape=(jax.ShapeDtypeStruct((B, C_OUT), jnp.float32),   # y
                   jax.ShapeDtypeStruct((1, 1), jnp.float32)),      # R (SMEM)
        in_specs=[pl.BlockSpec(memory_space=pltpu.MemorySpace.VMEM)] * 3,
        out_specs=(pl.BlockSpec(memory_space=pltpu.MemorySpace.VMEM),
                   pl.BlockSpec(memory_space=pltpu.MemorySpace.SMEM)),
        cost_estimate=pl.CostEstimate(flops=flops,
                                      transcendentals=B * HID,
                                      bytes_accessed=bytes_accessed),
    )(x_flat, w1, w2)
    return y, r[0, 0]


# ---------------------------------------------------------------------------
# Pure-JAX reference (mirrors the torch module's autograd loop exactly).
# ---------------------------------------------------------------------------
def _reference(x_flat, w1, w2):
    def model(xf):
        h = jnp.dot(xf, w1, precision=lax.Precision.HIGHEST)
        return jnp.dot(jnp.tanh(h), w2, precision=lax.Precision.HIGHEST)

    y, vjp_fn = jax.vjp(model, x_flat)
    j2 = 0.0
    for ii in range(C_OUT):
        v = jnp.zeros((B, C_OUT), jnp.float32).at[:, ii].set(1.0)
        (jv,) = vjp_fn(v)
        j2 = j2 + C_OUT * jnp.sum(jv * jv) / (C_OUT * B)
    return 0.5 * j2, y


if __name__ == "__main__":
    key = jax.random.PRNGKey(0)
    kx, k1, k2 = jax.random.split(key, 3)

    x = jax.random.normal(kx, (B, C_IN, H_IN, W_IN), dtype=jnp.float32)  # NCHW

    # deterministic synthetic network weights
    w1 = 0.05 * jax.random.normal(k1, (D, HID), dtype=jnp.float32)
    w2 = 0.05 * jax.random.normal(k2, (HID, C_OUT), dtype=jnp.float32)

    # fused Pallas kernel: forward y plus Jacobian-trace regularizer R
    y, R = jacobian_reg_forward(x, w1, w2)
    y = jax.block_until_ready(y)
    R = jax.block_until_ready(R)

    # Correctness check against the pure-JAX autograd reference.  Tolerances
    # account for bf16 MXU operands (f32 accumulation): ~0.3% relative on y,
    # amplified ~2x by the squared-Frobenius reduction for R.
    R_ref, y_ref = _reference(x.reshape(B, -1), w1, w2)
    assert jnp.allclose(y, y_ref, rtol=1e-2, atol=5e-3), (y, y_ref)
    assert jnp.allclose(R, R_ref, rtol=2e-2, atol=1e-5), (R, R_ref)

    print("KERNEL_OK")
</pallas_src>

<mosaic_0001>
module attributes {stable_mosaic.version = 11 : i64} {
  func.func @_fused_kernel(%arg0: memref<2x256xf32, #tpu.memory_space<vmem>>, %arg1: memref<256x128xf32, #tpu.memory_space<vmem>>, %arg2: memref<128x32xf32, #tpu.memory_space<vmem>>, %arg3: memref<2x32xf32, #tpu.memory_space<vmem>>, %arg4: memref<1x1xf32, #tpu.memory_space<smem>>) attributes {dimension_semantics = [], scalar_prefetch = 0 : i64, scratch_operands = 0 : i64, tpu.core_type = #tpu.core_type<tc>} {
    %c0 = arith.constant 0 : index
    %c0_0 = arith.constant 0 : index
    %0 = vector.load %arg0[%c0, %c0_0] : memref<2x256xf32, #tpu.memory_space<vmem>>, vector<2x256xf32>
    %c0_1 = arith.constant 0 : index
    %c0_2 = arith.constant 0 : index
    %1 = vector.load %arg1[%c0_1, %c0_2] : memref<256x128xf32, #tpu.memory_space<vmem>>, vector<256x128xf32>
    %c0_3 = arith.constant 0 : index
    %c0_4 = arith.constant 0 : index
    %2 = vector.load %arg2[%c0_3, %c0_4] : memref<128x32xf32, #tpu.memory_space<vmem>>, vector<128x32xf32>
    %cst = arith.constant dense<0.000000e+00> : vector<2x128xf32>
    %3 = tpu.matmul %0, %1, %cst {dimension_numbers = #tpu.dot_dimension_numbers<[1], [0], [0], [1], [0, 0, 1, 1], [], []>} : vector<2x256xf32>, vector<256x128xf32>, vector<2x128xf32> -> vector<2x128xf32>
    %4 = math.tanh %3 : vector<2x128xf32>
    %5 = arith.truncf %4 : vector<2x128xf32> to vector<2x128xbf16>
    %6 = arith.truncf %2 : vector<128x32xf32> to vector<128x32xbf16>
    %cst_5 = arith.constant dense<0.000000e+00> : vector<2x32xf32>
    %7 = tpu.matmul %5, %6, %cst_5 {dimension_numbers = #tpu.dot_dimension_numbers<[1], [0], [0], [1], [0, 0, 1, 1], [], []>} : vector<2x128xbf16>, vector<128x32xbf16>, vector<2x32xf32> -> vector<2x32xf32>
    %c0_6 = arith.constant 0 : index
    %c0_7 = arith.constant 0 : index
    %8 = vector.load %arg3[%c0_6, %c0_7] : memref<2x32xf32, #tpu.memory_space<vmem>>, vector<2x32xf32>
    tpu.vector_store %arg3[%c0_6, %c0_7], %7 {strides = array<i32>} : memref<2x32xf32, #tpu.memory_space<vmem>>, vector<2x32xf32>,
    %9 = arith.mulf %4, %4 : vector<2x128xf32>
    %cst_8 = arith.constant 1.000000e+00 : f32
    %10 = vector.broadcast %cst_8 : f32 to vector<2x128xf32>
    %11 = arith.subf %10, %9 : vector<2x128xf32>
    %12 = tpu.transpose %2, [1, 0] : vector<128x32xf32> -> vector<32x128xf32>
    %13 = vector.shape_cast %11 : vector<2x128xf32> to vector<2x1x128xf32>
    %14 = vector.shape_cast %12 : vector<32x128xf32> to vector<1x32x128xf32>
    %15 = vector.broadcast %13 : vector<2x1x128xf32> to vector<2x32x128xf32>
    %16 = vector.broadcast %14 : vector<1x32x128xf32> to vector<2x32x128xf32>
    %17 = arith.mulf %15, %16 : vector<2x32x128xf32>
    %18 = vector.shape_cast %17 : vector<2x32x128xf32> to vector<64x128xf32>
    %19 = arith.truncf %18 : vector<64x128xf32> to vector<64x128xbf16>
    %20 = arith.truncf %1 : vector<256x128xf32> to vector<256x128xbf16>
    %cst_9 = arith.constant dense<0.000000e+00> : vector<64x256xf32>
    %21 = tpu.matmul %19, %20, %cst_9 {dimension_numbers = #tpu.dot_dimension_numbers<[1], [1], [0], [0], [0, 0, 1, 0], [], []>} : vector<64x128xbf16>, vector<256x128xbf16>, vector<64x256xf32> -> vector<64x256xf32>
    %22 = arith.mulf %21, %21 : vector<64x256xf32>
    %23 = vector.shape_cast %22 : vector<64x256xf32> to vector<1x64x256xf32>
    %cst_10 = arith.constant dense<0.000000e+00> : vector<1xf32>
    %24 = vector.multi_reduction <add>, %23, %cst_10 [1, 2] : vector<1x64x256xf32> to vector<1xf32>
    %25 = vector.shape_cast %24 : vector<1xf32> to vector<1x1x1xf32>
    %26 = vector.extract %25[0, 0, 0] : f32 from vector<1x1x1xf32>
    %cst_11 = arith.constant 2.500000e-01 : f32
    %27 = arith.mulf %cst_11, %26 : f32
    %c0_12 = arith.constant 0 : index
    %c0_13 = arith.constant 0 : index
    %28 = memref.load %arg4[%c0_12, %c0_13] : memref<1x1xf32, #tpu.memory_space<smem>>
    memref.store %27, %arg4[%c0_12, %c0_13] : memref<1x1xf32, #tpu.memory_space<smem>>
    return
  }
}

</mosaic_0001>

<bundles_post_ra>
// kernel: tpu_custom_call.1
= control target key start
LH: loop header
LB: loop body
LE: loop exit
PB: predicated region body
PF: predicated region fallthrough
CT: control target
= control target key end

     0   :  { %10 = vsyncpa [#allocation3], 0  ;;  %s648_s0 = inlined_call_operand.vmem [shape: f32[2,256], index: 0, kind: input, shape index: {}]   ;;  %s649_s1 = inlined_call_operand.hbm [shape: f32[256,128], index: 1, kind: input, shape index: {}]   ;;  %s650_s2 = inlined_call_operand.vmem [shape: f32[128,32], index: 2, kind: input, shape index: {}]   ;;  %s651_s3 = inlined_call_operand.hbm [shape: f32[2,32], index: 3, kind: output, shape index: {0}]   ;;  %s652_s4 = inlined_call_operand.hbm [shape: f32[1,1], index: 4, kind: output, shape index: {1}]  }
   0x1   :  { %11 = vsyncpa [#allocation4], 0 }
   0x2   :  { %12 = vsyncpa [#allocation5], 0  ;;  %s19_s17 = sshll.u32 %s649_s1, 4  ;;  %s438_s18 = smov [#allocation2]   ;;  %s20_s17 = int_to_ptr.hbm [resolvable:$true] %s19_s17 }
   0x3   :  { %s21_s19 = sshll.u32 %s438_s18, 4  ;;  %s439_s20 = smov 128   ;;  %s22_s19 = int_to_ptr.vmem [resolvable:$true] %s21_s19 }
   0x4   :  { %s440_s21 = smov 8  }
   0x5   :  { %27 = dma.hbm_to_vmem [thread:$0]  %s20_s17, 4096, %s22_s19, [#allocation3], %s439_s20, %s439_s20, %s440_s21  }
   0x6   :  { %432 = dma.done.wait [#allocation3], 4096  }
   0x7   :  { %433 = vsyncadd [#allocation3], 4294963200  ;;  %v471_v0 = vld [vmem:[#allocation2 + $0x78] sm:$0xff]  ;;  %v473_v1 = vld [vmem:[#allocation2 + $0x70] sm:$0xff]  ;;  %vm152_vm0 = vcmask 254976   ;;  %s330_s29 = sshll.u32 %s651_s3, 4  ;;  %s331_s29 = int_to_ptr.hbm [resolvable:$true] %s330_s29 }
   0x8   :  { %89 = vmatpush.msra.mxu1 %v471_v0  ;;  %v476_v2 = vld [vmem:[#allocation2 + $0x68] sm:$0xff]  ;;  %v481_v3 = vld [vmem:[%s650_s2] sm:$0xff]  ;;  %v485_v4 = vld [vmem:[#allocation2 + $0x60] sm:$0xff]  ;;  %v213_v55 = vpack.c.bf16 %v471_v0, %v473_v1  ;;  %s339_s6 = sshll.u32 %s652_s4, 4  ;;  %s442_s3 = smov [#allocation7]   ;;  %s340_s6 = int_to_ptr.hbm [resolvable:$true] %s339_s6 }
   0x9   :  { %156 = vxpose.xlu0.b32.start [1/16] (narrow) %v481_v3, 32  ;;  %v488_v5 = vld [vmem:[#allocation2 + $0x58] sm:$0xff]  ;;  %v491_v6 = vld [vmem:[#allocation2 + $0x50] sm:$0xff]  ;;  %v496_v7 = vld [vmem:[%s650_s2 + $0x8] sm:$0xff]  ;;  %v212_v61 = vpack.c.bf16 %v476_v2, %v485_v4 }
   0xa   :  { %90 = vmatpush.msra.mxu1 %v473_v1  ;;  %v499_v8 = vld [vmem:[#allocation2 + $0x48] sm:$0xff]  ;;  %v503_v9 = vld [vmem:[#allocation2 + $0x40] sm:$0xff]  ;;  %v506_v10 = vld [vmem:[#allocation2 + $0x38] sm:$0xff]  ;;  %222 = vmatpush.bf16.xpose.msra.mxu3 %v213_v55  ;;  %v131_v1 = vpack.c.bf16 %v496_v7, %v481_v3 }
   0xb   :  { %v34_v11 = vld [vmem:[%s648_s0] sm:$0xf]  ;;  %v512_v12 = vld [vmem:[#allocation2 + $0x30] sm:$0xff]  ;;  %v517_v13 = vld [vmem:[%s650_s2 + $0x10] sm:$0xff] }
   0xc   :  { %91 = vmatpush.msra.mxu1 %v476_v2  ;;  %84 = vst [vmem:[#allocation1] ss:$4 sm:$0xff] %v34_v11  ;;  %v520_v14 = vld [vmem:[#allocation2 + $0x28] sm:$0xff]  ;;  %v524_v15 = vld [vmem:[#allocation2 + $0x20] sm:$0xff]  ;;  %v527_v16 = vld [vmem:[#allocation2 + $0x18] sm:$0xff]  ;;  %v211_v11 = vpack.c.bf16 %v488_v5, %v491_v6  ;;  %v210_v2 = vpack.c.bf16 %v499_v8, %v503_v9 }
   0xd   :  { %v530_v17 = vld [vmem:[#allocation2 + $0x10] sm:$0xff]  ;;  %v538_v19 = vld [vmem:[#allocation2 + $0x8] sm:$0xff]  ;;  %v542_v20 = vld [vmem:[#allocation2] sm:$0xff]  ;;  %v208_v3 = vpack.c.bf16 %v520_v14, %v524_v15 }
   0xe   :  { %92 = vmatpush.msra.mxu1 %v485_v4  ;;  %v535_v18 = vld [vmem:[%s650_s2 + $0x18] sm:$0xff]  ;;  %v545_v21 = vld [vmem:[#allocation2 + $0xf8] sm:$0xff]  ;;  %v554_v25 = vld [vmem:[#allocation2 + $0xe8] sm:$0xff]  ;;  %v209_v4 = vpack.c.bf16 %v506_v10, %v512_v12 }
   0xf   :  { %v65_v23 = vld [vmem:[#allocation2 + $0xf0] sm:$0xff]  ;;  %v552_v24 = vld [vmem:[%s650_s2 + $0x20] sm:$0xff]  ;;  %v556_v26 = vld [vmem:[#allocation2 + $0xe0] sm:$0xff]  ;;  %v132_v63 = vpack.c.bf16 %v535_v18, %v517_v13 }
  0x10   :  { %93 = vmatpush.msra.mxu1 %v488_v5  ;;  %v62_v27 = vld [vmem:[#allocation2 + $0xd8] sm:$0xff]  ;;  %v61_v28 = vld [vmem:[#allocation2 + $0xd0] sm:$0xff]  ;;  %v72_v29 = vld [vmem:[%s650_s2 + $0x28] sm:$0xff]  ;;  %v221_v56 = vpack.c.bf16 %v545_v21, %v65_v23  ;;  %v220_v62 = vpack.c.bf16 %v554_v25, %v556_v26 }
  0x11   :  { %157 = vxpose.xlu0.b32.cont [2/16] (narrow) %v496_v7, 32  ;;  %v60_v30 = vld [vmem:[#allocation2 + $0xc8] sm:$0xff]  ;;  %v59_v31 = vld [vmem:[#allocation2 + $0xc0] sm:$0xff]  ;;  %v58_v32 = vld [vmem:[#allocation2 + $0xb8] sm:$0xff]  ;;  %v219_v58 = vpack.c.bf16 %v62_v27, %v61_v28  ;;  %v133_v60 = vpack.c.bf16 %v72_v29, %v552_v24 }
  0x12   :  { %94 = vmatpush.msra.mxu1 %v491_v6  ;;  %v57_v33 = vld [vmem:[#allocation2 + $0xb0] sm:$0xff]  ;;  %v73_v34 = vld [vmem:[%s650_s2 + $0x30] sm:$0xff]  ;;  %v569_v36 = vld [vmem:[#allocation2 + $0xa0] sm:$0xff]  ;;  %251 = vmatpush.bf16.xpose.msra.mxu0 %v221_v56  ;;  %v218_v59 = vpack.c.bf16 %v60_v30, %v59_v31  ;;  %v207_v6 = vpack.c.bf16 %v527_v16, %v530_v17 }
  0x13   :  { %v85_v22 = vld.sshfl [vmem:[#allocation1] sm:$0xff pattern:$0x73625140]  ;;  %v567_v35 = vld [vmem:[#allocation2 + $0xa8] sm:$0xff]  ;;  %v575_v38 = vld [vmem:[#allocation2 + $0x90] sm:$0xff]  ;;  %223 = vmatpush.bf16.xpose.msra.mxu3 %v212_v61  ;;  %v217_v0 = vpack.c.bf16 %v58_v32, %v57_v33 }
  0x14   :  { %95 = vmatpush.msra.mxu1 %v499_v8  ;;  %v572_v37 = vld [vmem:[#allocation2 + $0x98] sm:$0xff]  ;;  %v74_v39 = vld [vmem:[%s650_s2 + $0x38] sm:$0xff]  ;;  %v581_v40 = vld [vmem:[#allocation2 + $0x88] sm:$0xff]  ;;  %v216_v5 = vpack.c.bf16 %v567_v35, %v569_v36  ;;  %v206_v8 = vpack.c.bf16 %v538_v19, %v542_v20 }
  0x15   :  { %v584_v41 = vld [vmem:[#allocation2 + $0x80] sm:$0xff]  ;;  %v75_v43 = vld [vmem:[%s650_s2 + $0x40] sm:$0xff]  ;;  %v81_v45 = vld [vmem:[%s650_s2 + $0x70] sm:$0xff]  ;;  %v134_v57 = vpack.c.bf16 %v74_v39, %v73_v34  ;;  %v215_v7 = vpack.c.bf16 %v572_v37, %v575_v38 }
  0x16   :  { %96 = vmatpush.msra.mxu1 %v503_v9  ;;  %v86_v42 = vld.sshfl [vmem:[#allocation1 + $0x8] sm:$0xff pattern:$0x73625140]  ;;  %v82_v46 = vld [vmem:[%s650_s2 + $0x78] sm:$0xff]  ;;  %v77_v48 = vld [vmem:[%s650_s2 + $0x50] sm:$0xff]  ;;  %v214_v9 = vpack.c.bf16 %v581_v40, %v584_v41 }
  0x17   :  { %v76_v44 = vld [vmem:[%s650_s2 + $0x48] sm:$0xff]  ;;  %v138_v47 = vpack.c.bf16 %v82_v46, %v81_v45  ;;  %v79_v49 = vld [vmem:[%s650_s2 + $0x60] sm:$0xff]  ;;  %v78_v52 = vld [vmem:[%s650_s2 + $0x58] sm:$0xff] }
  0x18   :  { %97 = vmatpush.msra.mxu1 %v506_v10  ;;  %v80_v50 = vld [vmem:[%s650_s2 + $0x68] sm:$0xff]  ;;  %v136_v53 = vpack.c.bf16 %v78_v52, %v77_v48  ;;  %v135_v54 = vpack.c.bf16 %v76_v44, %v75_v43  ;;  %s441_s2 = smov [#allocation6]  }
  0x19   :  { %158 = vxpose.xlu0.b32.cont [3/16] (narrow) %v517_v13, 32  ;;  %139 = vmatpush.bf16.msra.mxu2 %v138_v47  ;;  %v137_v51 = vpack.c.bf16 %v80_v50, %v79_v49  ;;  %s328_s27 = sshll.u32 %s441_s2, 4  ;;  %s329_s27 = int_to_ptr.vmem [resolvable:$true] %s328_s27 }
  0x1a   :  { %98 = vmatpush.msra.mxu1 %v512_v12  ;;  %252 = vmatpush.bf16.xpose.msra.mxu0 %v220_v62 }
  0x1b   :  { %224 = vmatpush.bf16.xpose.msra.mxu3 %v211_v11 }
  0x1c   :  { %99 = vmatpush.msra.mxu1 %v520_v14 }
  0x1d   :  { %140 = vmatpush.bf16.msra.mxu2 %v137_v51 }
  0x1e   :  { %100 = vmatpush.msra.mxu1 %v524_v15 }
  0x20   :  { %101 = vmatpush.msra.mxu1 %v527_v16 }
  0x21   :  { %159 = vxpose.xlu0.b32.cont [4/16] (narrow) %v535_v18, 32  ;;  %141 = vmatpush.bf16.msra.mxu2 %v136_v53 }
  0x22   :  { %102 = vmatpush.msra.mxu1 %v530_v17  ;;  %253 = vmatpush.bf16.xpose.msra.mxu0 %v219_v58 }
  0x23   :  { %225 = vmatpush.bf16.xpose.msra.mxu3 %v210_v2 }
  0x24   :  { %103 = vmatpush.msra.mxu1 %v538_v19 }
  0x25   :  { %142 = vmatpush.bf16.msra.mxu2 %v135_v54 }
  0x26   :  { %104 = vmatpush.msra.mxu1 %v542_v20 }
  0x27   :  { %105 = vmatmul.f32.vlgmr.msra.gmra.mxu1 %v85_v22 }
  0x28   :  { %109 = vmatpush.msrb.mxu1 %v545_v21 }
  0x29   :  { %160 = vxpose.xlu0.b32.cont [5/16] (narrow) %v552_v24, 32  ;;  %143 = vmatpush.bf16.msra.mxu2 %v134_v57 }
  0x2a   :  { %110 = vmatpush.msrb.mxu1 %v65_v23  ;;  %254 = vmatpush.bf16.xpose.msra.mxu0 %v218_v59 }
  0x2b   :  { %226 = vmatpush.bf16.xpose.msra.mxu3 %v209_v4 }
  0x2c   :  { %111 = vmatpush.msrb.mxu1 %v554_v25 }
  0x2d   :  { %144 = vmatpush.bf16.msra.mxu2 %v133_v60 }
  0x2e   :  { %112 = vmatpush.msrb.mxu1 %v556_v26 }
  0x30   :  { %113 = vmatpush.msrb.mxu1 %v62_v27 }
  0x31   :  { %161 = vxpose.xlu0.b32.cont [6/16] (narrow) %v72_v29, 32  ;;  %145 = vmatpush.bf16.msra.mxu2 %v132_v63 }
  0x32   :  { %114 = vmatpush.msrb.mxu1 %v61_v28  ;;  %255 = vmatpush.bf16.xpose.msra.mxu0 %v217_v0 }
  0x33   :  { %227 = vmatpush.bf16.xpose.msra.mxu3 %v208_v3 }
  0x34   :  { %115 = vmatpush.msrb.mxu1 %v60_v30 }
  0x35   :  { %146 = vmatpush.bf16.msra.mxu2 %v131_v1 }
  0x36   :  { %116 = vmatpush.msrb.mxu1 %v59_v31 }
  0x38   :  { %117 = vmatpush.msrb.mxu1 %v58_v32 }
  0x39   :  { %162 = vxpose.xlu0.b32.cont [7/16] (narrow) %v73_v34, 32  ;;  %355 = vmatpush.bf16.xpose.msrb.mxu2 %v221_v56 }
  0x3a   :  { %118 = vmatpush.msrb.mxu1 %v57_v33  ;;  %256 = vmatpush.bf16.xpose.msra.mxu0 %v216_v5 }
  0x3b   :  { %228 = vmatpush.bf16.xpose.msra.mxu3 %v207_v6 }
  0x3c   :  { %119 = vmatpush.msrb.mxu1 %v567_v35 }
  0x3e   :  { %120 = vmatpush.msrb.mxu1 %v569_v36 }
  0x40   :  { %121 = vmatpush.msrb.mxu1 %v572_v37 }
  0x41   :  { %163 = vxpose.xlu0.b32.cont [8/16] (narrow) %v74_v39, 32  ;;  %356 = vmatpush.bf16.xpose.msrb.mxu2 %v220_v62 }
  0x42   :  { %122 = vmatpush.msrb.mxu1 %v575_v38  ;;  %257 = vmatpush.bf16.xpose.msra.mxu0 %v215_v7 }
  0x43   :  { %229 = vmatpush.bf16.xpose.msra.mxu3 %v206_v8 }
  0x44   :  { %123 = vmatpush.msrb.mxu1 %v581_v40 }
  0x46   :  { %124 = vmatpush.msrb.mxu1 %v584_v41 }
  0x47   :  { %125 = vmatmul.f32.vlgmr.msrb.gmra.mxu1 %v86_v42 }
  0x49   :  { %164 = vxpose.xlu0.b32.cont [9/16] (narrow) %v75_v43, 32  ;;  %357 = vmatpush.bf16.xpose.msrb.mxu2 %v219_v58 }
  0x4a   :  { %258 = vmatpush.bf16.xpose.msra.mxu0 %v214_v9 }
  0x51   :  { %165 = vxpose.xlu0.b32.cont [10/16] (narrow) %v76_v44, 32  ;;  %358 = vmatpush.bf16.xpose.msrb.mxu2 %v218_v59 }
  0x59   :  { %166 = vxpose.xlu0.b32.cont [11/16] (narrow) %v77_v48, 32  ;;  %359 = vmatpush.bf16.xpose.msrb.mxu2 %v217_v0 }
  0x61   :  { %167 = vxpose.xlu0.b32.cont [12/16] (narrow) %v78_v52, 32  ;;  %360 = vmatpush.bf16.xpose.msrb.mxu2 %v216_v5 }
  0x69   :  { %168 = vxpose.xlu0.b32.cont [13/16] (narrow) %v79_v49, 32  ;;  %361 = vmatpush.bf16.xpose.msrb.mxu2 %v215_v7 }
  0x71   :  { %169 = vxpose.xlu0.b32.cont [14/16] (narrow) %v80_v50, 32  ;;  %362 = vmatpush.bf16.xpose.msrb.mxu2 %v214_v9 }
  0x79   :  { %170 = vxpose.xlu0.b32.cont [15/16] (narrow) %v81_v45, 32 }
  0x81   :  { %171 = vxpose.xlu0.b32.end [16/16] (narrow) %v82_v46, 32 }
  0xa4   :  { %v106_v10 = vpop.f32.mrf.mxu1 }
  0xad   :  { %v172_v12 = vpop.trf.xlu0 }
  0xb5   :  { %v173_v14 = vpop.trf.xlu0 }
  0xbd   :  { %v174_v21 = vpop.trf.xlu0 }
  0xc4   :  { %v126_v13 = vpop.f32.mrf.mxu1 }
  0xc5   :  { %v127_v15 = vadd.f32 %v126_v13, %v106_v10  ;;  %v175_v27 = vpop.trf.xlu0 }
  0xc7   :  { %370 = vtanh.f32 %v127_v15 }
  0xcd   :  { %v371_v16 = vpop.eup %370 }
  0xce   :  { %v154_v17 = vmul.f32 %v371_v16, %v371_v16  ;;  %v130_v18 = vpack.c.bf16 %v371_v16, %v371_v16 }
  0xd0   :  { %v155_v22 = vsub.f32 1.0, %v154_v17  ;;  %147 = vmatmul.bf16.vlgmr.msra.gmra.mxu2 %v130_v18 }
  0xd2   :  { %v189_v23 = vrot.slane %v155_v22, 1  ;;  %v190_v19 = vperm.slane %v155_v22, 0 }
  0xd4   :  { %v194_v20 = vmul.f32 %v190_v19, %v172_v12  ;;  %v195_v24 = vmul.f32 %v190_v19, %v173_v14  ;;  %v191_v25 = vperm.slane %v189_v23, 0  ;;  %v196_v31 = vmul.f32 %v190_v19, %v174_v21 }
  0xd5   :  { %v197_v32 = vmul.f32 %v190_v19, %v175_v27 }
  0xd6   :  { %v202_v26 = vpack.c.bf16 %v195_v24, %v194_v20  ;;  %v200_v28 = vmul.f32 %v191_v25, %v174_v21  ;;  %v201_v29 = vmul.f32 %v191_v25, %v175_v27  ;;  %v198_v34 = vmul.f32 %v191_v25, %v172_v12 }
  0xd7   :  { %v203_v33 = vpack.c.bf16 %v197_v32, %v196_v31  ;;  %v199_v35 = vmul.f32 %v191_v25, %v173_v14 }
  0xd8   :  { %230 = vmatmul.bf16.vlgmr.msra.gmra.mxu3 %v202_v26  ;;  %259 = vmatmul.bf16.vlgmr.msra.gmra.mxu0 %v202_v26  ;;  %v205_v30 = vpack.c.bf16 %v201_v29, %v200_v28 }
  0xd9   :  { %v204_v36 = vpack.c.bf16 %v199_v35, %v198_v34 }
  0xe0   :  { %274 = vmatmul.bf16.vlgmr.msrb.gmra.mxu2 %v205_v30 }
  0xe8   :  { %235 = vmatmul.bf16.gmra.mxu3 %v203_v33  ;;  %264 = vmatmul.bf16.gmra.mxu0 %v203_v33 }
  0xf8   :  { %240 = vmatmul.bf16.gmra.mxu3 %v204_v36  ;;  %269 = vmatmul.bf16.gmra.mxu0 %v204_v36 }
 0x108   :  { %245 = vmatmul.bf16.gmra.mxu3 %v205_v30 }
 0x153   :  { %v148_v37 = vpop.f32.mrf.mxu2 }
 0x154   :  { %153 = vst.msk [vmem:[#allocation6] sm:$0x3] %vm152_vm0, %v148_v37 }
 0x155   :  { %v260_v38 = vpop.f32.mrf.mxu0  ;;  %333 = dma.vmem_to_hbm [thread:$0]  %s329_s27, 32, %s331_s29, [#allocation4]  }
 0x156   :  { %v281_v46 = vmul.f32 %v260_v38, %v260_v38 }
 0x15b   :  { %v150_v39 = vpop.f32.mrf.mxu2  ;;  %v231_v40 = vpop.f32.mrf.mxu3 }
 0x15c   :  { %v280_v45 = vmul.f32 %v231_v40, %v231_v40 }
 0x15d   :  { %v262_v41 = vpop.f32.mrf.mxu0 }
 0x15e   :  { %v296_v48 = vadd.f32 %v281_v46, %v280_v45  ;;  %v283_v51 = vmul.f32 %v262_v41, %v262_v41 }
 0x163   :  { %v233_v42 = vpop.f32.mrf.mxu3  ;;  %v275_v5 = vpop.f32.mrf.mxu2 }
 0x164   :  { %v282_v47 = vmul.f32 %v233_v42, %v233_v42  ;;  %v293_v14 = vmul.f32 %v275_v5, %v275_v5 }
 0x165   :  { %v265_v43 = vpop.f32.mrf.mxu0 }
 0x166   :  { %v297_v49 = vadd.f32 %v296_v48, %v282_v47  ;;  %v285_v56 = vmul.f32 %v265_v43, %v265_v43 }
 0x168   :  { %v298_v54 = vadd.f32 %v297_v49, %v283_v51 }
 0x16b   :  { %v236_v44 = vpop.f32.mrf.mxu3  ;;  %v277_v15 = vpop.f32.mrf.mxu2 }
 0x16c   :  { %v284_v52 = vmul.f32 %v236_v44, %v236_v44  ;;  %v295_v21 = vmul.f32 %v277_v15, %v277_v15 }
 0x16d   :  { %v267_v53 = vpop.f32.mrf.mxu0 }
 0x16e   :  { %v299_v55 = vadd.f32 %v298_v54, %v284_v52  ;;  %v287_v62 = vmul.f32 %v267_v53, %v267_v53 }
 0x170   :  { %v300_v59 = vadd.f32 %v299_v55, %v285_v56 }
 0x173   :  { %v238_v50 = vpop.f32.mrf.mxu3 }
 0x174   :  { %v286_v57 = vmul.f32 %v238_v50, %v238_v50 }
 0x175   :  { %v270_v61 = vpop.f32.mrf.mxu0 }
 0x176   :  { %v301_v60 = vadd.f32 %v300_v59, %v286_v57  ;;  %v289_v2 = vmul.f32 %v270_v61, %v270_v61 }
 0x178   :  { %v302_v0 = vadd.f32 %v301_v60, %v287_v62 }
 0x17b   :  { %v241_v58 = vpop.f32.mrf.mxu3 }
 0x17c   :  { %v288_v63 = vmul.f32 %v241_v58, %v241_v58 }
 0x17d   :  { %v272_v6 = vpop.f32.mrf.mxu0 }
 0x17e   :  { %v303_v11 = vadd.f32 %v302_v0, %v288_v63  ;;  %v291_v9 = vmul.f32 %v272_v6, %v272_v6 }
 0x180   :  { %v304_v3 = vadd.f32 %v303_v11, %v289_v2 }
 0x183   :  { %v243_v1 = vpop.f32.mrf.mxu3 }
 0x184   :  { %v290_v4 = vmul.f32 %v243_v1, %v243_v1 }
 0x186   :  { %v305_v7 = vadd.f32 %v304_v3, %v290_v4 }
 0x188   :  { %v306_v12 = vadd.f32 %v305_v7, %v291_v9 }
 0x18b   :  { %v246_v8 = vpop.f32.mrf.mxu3 }
 0x18c   :  { %v292_v10 = vmul.f32 %v246_v8, %v246_v8 }
 0x18e   :  { %v307_v13 = vadd.f32 %v306_v12, %v292_v10 }
 0x190   :  { %v308_v18 = vadd.f32 %v307_v13, %v293_v14 }
 0x193   :  { %v248_v16 = vpop.f32.mrf.mxu3 }
 0x194   :  { %v294_v17 = vmul.f32 %v248_v16, %v248_v16 }
 0x196   :  { %v309_v22 = vadd.f32 %v308_v18, %v294_v17 }
 0x198   :  { %v310_v23 = vadd.f32 %v309_v22, %v295_v21 }
 0x19a   :  { %311 = vadd.xlane.f32.xlu1 %v310_v23 }
 0x20d   :  { %v312_v19 = vpop.xlane.xlu1 %311 }
 0x20e   :  { %v313_v20 = vrot.slane %v312_v19, 4 }
 0x210   :  { %v314_v24 = vadd.f32 %v313_v20, %v312_v19 }
 0x212   :  { %v315_v25 = vrot.slane %v314_v24, 2 }
 0x214   :  { %v316_v26 = vadd.f32 %v315_v25, %v314_v24 }
 0x216   :  { %v317_v27 = vrot.slane %v316_v26, 1 }
 0x218   :  { %v318_v28 = vadd.f32 %v317_v27, %v316_v26 }
 0x21a   :  { %363 = vpush %v318_v28 }
 0x24b   :  { %s364_s7 = spop %363 }
 0x24c   :  { %s320_s8 = smul.f32 0.25, %s364_s7 }
 0x24e   :  { %322 = sst [smem:[#allocation7]] %s320_s8 }
 0x24f   :  { %342 = dma.smem_to_hbm %s442_s3, 16, %s340_s6, [#allocation5]  }
 0x250   :  { %434 = dma.done.wait [#allocation4], 32  }
 0x251   :  { %435 = vsyncadd [#allocation4], 4294967264 }
 0x252   :  { %436 = dma.done.wait [#allocation5], 16  }
 0x253   :  { %437 = vsyncadd [#allocation5], 4294967280 }
 0x254   :  { %351 = sfence }
 0x255   :  { %352 = vsyncpa [#allocation3], 1 }
 0x256   :  { %353 = vsyncpa [#allocation4], 1 }
 0x257   :  { %354 = vsyncpa [#allocation5], 1 }

</bundles_post_ra>
